<compile_context>
chip_gen: v7x
topology: tpu7x:2x2x1
jax: 0.10.0
libtpu: 0.0.40
codegen_flags: <defaults>
</compile_context>

<pallas_src>
import jax
import jax.numpy as jnp
from jax.experimental import pallas as pl
from jax.experimental.pallas import tpu as pltpu

WINS = 10       # default number of time steps (`wins` in the reference)
V_TH = 0.0      # v_th_scales in the reference


# ---------------------------------------------------------------------------
# Phase 1: hoisted layer-1 GEMM    state1[t] = x[t] @ W1 + b1
# ---------------------------------------------------------------------------
def _layer1_kernel(x_ref, w1_ref, b1_ref, s1_ref):
    s1_ref[...] = (
        jnp.dot(x_ref[...], w1_ref[...], preferred_element_type=jnp.float32)
        + b1_ref[...]
    )


# ---------------------------------------------------------------------------
# Phase 2: serial spiking recurrence over time (membranes + layers 2, 3)
# ---------------------------------------------------------------------------
def _recurrence_kernel(gate_ref,                                  # SMEM (2,) f32
                       s1_ref, w2_ref, b2_ref, w3_ref, b3_ref,
                       outs_ref, outs1_ref, outs2_ref,
                       h1_mem, h1_spk, h2_mem, h2_spk, h3_mem, h3_spk):
    t = pl.program_id(1)
    nt = pl.num_programs(1)

    # Zero recurrent state and output accumulators at the first time step of
    # every batch tile (outputs act as VMEM-resident accumulators over t).
    @pl.when(t == 0)
    def _():
        for r in (h1_mem, h1_spk, h2_mem, h2_spk, h3_mem, h3_spk,
                  outs_ref, outs1_ref, outs2_ref):
            r[...] = jnp.zeros_like(r)

    gate0 = gate_ref[0]
    gate1 = gate_ref[1]

    # ---- layer 1: linear state precomputed by phase 1 ----------------------
    state1 = s1_ref[...]                                           # (TB, C) f32
    m1 = h1_mem[...] * (1.0 - h1_spk[...]) + state1
    a1 = jnp.where((m1 - V_TH) > 0.0, 1.0, 0.0)                    # binary spike
    s1 = a1 * gate0                                                # gated spike
    h1_mem[...] = m1
    h1_spk[...] = s1
    outs1_ref[...] += s1

    # ---- layer 2:  linear_2(a1 * g0) == g0 * (a1 @ W2) + b2 ----------------
    z2 = jnp.dot(a1.astype(jnp.bfloat16), w2_ref[...],
                 preferred_element_type=jnp.float32)
    state2 = gate0 * z2 + b2_ref[...]
    m2 = h2_mem[...] * (1.0 - h2_spk[...]) + state2
    a2 = jnp.where((m2 - V_TH) > 0.0, 1.0, 0.0)
    s2 = a2 * gate1
    h2_mem[...] = m2
    h2_spk[...] = s2
    outs2_ref[...] += s2

    # ---- layer 3 (gate == 1) ------------------------------------------------
    z3 = jnp.dot(a2.astype(jnp.bfloat16), w3_ref[...],
                 preferred_element_type=jnp.float32)
    state3 = gate1 * z3 + b3_ref[...]
    m3 = h3_mem[...] * (1.0 - h3_spk[...]) + state3
    s3 = jnp.where((m3 - V_TH) > 0.0, 1.0, 0.0)
    h3_mem[...] = m3
    h3_spk[...] = s3
    outs_ref[...] += s3

    # ---- finalize: time-averaged spike rates --------------------------------
    @pl.when(t == nt - 1)
    def _():
        inv = 1.0 / nt
        outs_ref[...] *= inv
        outs1_ref[...] *= inv
        outs2_ref[...] *= inv


def _phase2_vmem_bytes(tb, c, op):
    """Rough VMEM estimate for one phase-2 batch tile (double buffers incl.)."""
    f32, bf16 = 4, 2
    state1_in = 2 * tb * c * f32                       # pipelined input
    outputs = 2 * (tb * op + 2 * tb * c) * f32         # 3 resident accumulators
    scratch = (4 * tb * c + 2 * tb * op) * f32         # mem/spike state
    weights = 2 * ((c * c + c * op) * bf16 + (c + op) * f32)
    return state1_in + outputs + scratch + weights


def _pick_batch_tile(b, c, op, budget=12 * 1024 * 1024):
    """Largest batch tile (full batch or a sublane-aligned divisor of b) whose
    phase-2 working set fits the VMEM budget.  Bigger tiles = fewer serial grid
    steps and better MXU row utilization; the recurrence is overhead-bound."""
    cands = sorted({b} | {tb for tb in range(8, b, 8) if b % tb == 0},
                   reverse=True)
    for tb in cands:
        if _phase2_vmem_bytes(tb, c, op) <= budget:
            return tb
    return cands[-1]


def main_net_forward(x, gate, params, *, batch_tile=None):
    """x: (B, T, D_in) f32; gate: (2,) f32; params: dict of (in, out) weights."""
    B, T, D = x.shape
    C = params["w1"].shape[1]
    O = params["w3"].shape[1]
    OP = max(128, ((O + 127) // 128) * 128)        # lane-dense padded out width

    # ----------------- phase 1: hoisted layer-1 GEMM -------------------------
    x_tbd = jnp.transpose(x, (1, 0, 2)).astype(jnp.bfloat16)   # (T, B, D): one
    w1 = params["w1"].astype(jnp.bfloat16)                     # contiguous DMA/step
    b1 = params["b1"].astype(jnp.float32)

    state1 = pl.pallas_call(
        _layer1_kernel,
        out_shape=jax.ShapeDtypeStruct((T, B, C), jnp.float32),
        grid_spec=pltpu.PrefetchScalarGridSpec(
            num_scalar_prefetch=0,
            grid=(T,),
            in_specs=[
                pl.BlockSpec((pl.Squeezed(), B, D), lambda t: (t, 0, 0)),  # x[t]
                pl.BlockSpec((D, C), lambda t: (0, 0)),                    # w1
                pl.BlockSpec((1, C), lambda t: (0, 0)),                    # b1
            ],
            out_specs=pl.BlockSpec((pl.Squeezed(), B, C), lambda t: (t, 0, 0)),
        ),
        compiler_params=pltpu.CompilerParams(
            dimension_semantics=("parallel",),
        ),
    )(x_tbd, w1, b1)

    # ----------------- phase 2: spiking recurrence ---------------------------
    w2 = params["w2"].astype(jnp.bfloat16)
    b2 = params["b2"].astype(jnp.float32)
    # Zero-pad layer 3 to a lane-dense width (padded columns never spike).
    w3p = jnp.zeros((C, OP), jnp.bfloat16).at[:, :O].set(
        params["w3"].astype(jnp.bfloat16))
    b3p = jnp.zeros((1, OP), jnp.float32).at[:, :O].set(
        params["b3"].astype(jnp.float32))

    TB = _pick_batch_tile(B, C, OP) if batch_tile is None else batch_tile
    nb = B // TB

    out_shape = (
        jax.ShapeDtypeStruct((B, OP), jnp.float32),   # outs   (padded)
        jax.ShapeDtypeStruct((B, C), jnp.float32),    # outs_1
        jax.ShapeDtypeStruct((B, C), jnp.float32),    # outs_2
    )
    in_specs = [
        pl.BlockSpec(memory_space=pltpu.MemorySpace.SMEM),                   # gate (2,)
        pl.BlockSpec((pl.Squeezed(), TB, C), lambda b, t: (t, b, 0)),        # state1
        pl.BlockSpec((C, C), lambda b, t: (0, 0)),                           # w2
        pl.BlockSpec((1, C), lambda b, t: (0, 0)),                           # b2
        pl.BlockSpec((C, OP), lambda b, t: (0, 0)),                          # w3 (padded)
        pl.BlockSpec((1, OP), lambda b, t: (0, 0)),                          # b3 (padded)
    ]
    out_specs = (
        pl.BlockSpec((TB, OP), lambda b, t: (b, 0)),
        pl.BlockSpec((TB, C), lambda b, t: (b, 0)),
        pl.BlockSpec((TB, C), lambda b, t: (b, 0)),
    )
    scratch_shapes = [
        pltpu.VMEM((TB, C), jnp.float32),    # h1_mem
        pltpu.VMEM((TB, C), jnp.float32),    # h1_spike
        pltpu.VMEM((TB, C), jnp.float32),    # h2_mem
        pltpu.VMEM((TB, C), jnp.float32),    # h2_spike
        pltpu.VMEM((TB, OP), jnp.float32),   # h3_mem
        pltpu.VMEM((TB, OP), jnp.float32),   # h3_spike
    ]

    outs_p, outs1, outs2 = pl.pallas_call(
        _recurrence_kernel,
        out_shape=out_shape,
        grid_spec=pltpu.PrefetchScalarGridSpec(
            num_scalar_prefetch=0,
            grid=(nb, T),                     # batch tiles outer, time inner
            in_specs=in_specs,
            out_specs=out_specs,
            scratch_shapes=scratch_shapes,
        ),
        compiler_params=pltpu.CompilerParams(
            dimension_semantics=("parallel", "arbitrary"),
        ),
    )(gate.astype(jnp.float32), state1, w2, b2, w3p, b3p)

    return outs_p[:, :O], outs1, outs2


# ---------------------------------------------------------------------------
# Pure-JAX f32 reference: literal port of the PyTorch forward.
# ---------------------------------------------------------------------------
def ref_forward(x, gate, params):
    B, T, _ = x.shape
    C = params["w1"].shape[1]
    O = params["w3"].shape[1]
    z = lambda n: jnp.zeros((B, n), jnp.float32)
    h1m, h1s, h1sum = z(C), z(C), z(C)
    h2m, h2s, h2sum = z(C), z(C), z(C)
    h3m, h3s, h3sum = z(O), z(O), z(O)
    for t in range(T):
        y = x[:, t, :]
        st1 = y @ params["w1"] + params["b1"]
        h1m = h1m * (1.0 - h1s) + st1
        h1s = (h1m - V_TH > 0.0).astype(jnp.float32) * gate[0]
        st2 = h1s @ params["w2"] + params["b2"]
        h2m = h2m * (1.0 - h2s) + st2
        h2s = (h2m - V_TH > 0.0).astype(jnp.float32) * gate[1]
        st3 = h2s @ params["w3"] + params["b3"]
        h3m = h3m * (1.0 - h3s) + st3
        h3s = (h3m - V_TH > 0.0).astype(jnp.float32)
        h1sum += h1s
        h2sum += h2s
        h3sum += h3s
    return h3sum / T, h1sum / T, h2sum / T


def init_params(key, d_in, channels, n_out):
    """nn.Linear-style U(-1/sqrt(fan_in), 1/sqrt(fan_in)) init, quantized to
    multiples of 2^-10 so every weight is exactly representable in bfloat16
    (keeps the bf16 kernel bit-comparable to the f32 reference)."""
    ks = jax.random.split(key, 6)

    def q(v):
        return jnp.round(v * 1024.0) / 1024.0

    def linear(kw, kb, fan_in, fan_out):
        bound = 1.0 / float(fan_in) ** 0.5
        w = q(jax.random.uniform(kw, (fan_in, fan_out), jnp.float32, -bound, bound))
        b = q(jax.random.uniform(kb, (1, fan_out), jnp.float32, -bound, bound))
        return w, b

    w1, b1 = linear(ks[0], ks[1], d_in, channels)
    w2, b2 = linear(ks[2], ks[3], channels, channels)
    w3, b3 = linear(ks[4], ks[5], channels, n_out)
    return {"w1": w1, "b1": b1, "w2": w2, "b2": b2, "w3": w3, "b3": b3}


if __name__ == "__main__":
    # Small shapes consistent with the module (production: batch=200,
    # channels=512, D_in=34*34*2=2312, wins=10, 10 classes).
    B = 8
    C = 32
    D_IN = 34 * 34 * 2
    N_OUT = 10
    T = WINS

    key = jax.random.PRNGKey(0)
    kx, kp = jax.random.split(key, 2)

    # Inputs/weights are quantized to coarse dyadic values (exact in bfloat16)
    # and the gates are dyadic, so the bf16-MXU kernel and the f32 reference
    # produce identical spike trains: the hard >0 threshold would otherwise
    # let ULP-level rounding differences flip individual spikes.
    x = jnp.round(jax.random.normal(kx, (B, T, D_IN), jnp.float32) * 4.0) / 4.0
    gate = jnp.array([0.5, 0.5], jnp.float32)      # gate[0], gate[1]
    params = init_params(kp, D_IN, C, N_OUT)

    outs, outs1, outs2 = main_net_forward(x, gate, params)
    outs = jax.block_until_ready(outs)
    outs1 = jax.block_until_ready(outs1)
    outs2 = jax.block_until_ready(outs2)

    # Correctness check against the pure-JAX port of the PyTorch forward.
    r_outs, r_outs1, r_outs2 = ref_forward(x, gate, params)
    assert outs.shape == (B, N_OUT)
    assert jnp.allclose(outs, r_outs, atol=1e-5), "outs mismatch"
    assert jnp.allclose(outs1, r_outs1, atol=1e-5), "outs_1 mismatch"
    assert jnp.allclose(outs2, r_outs2, atol=1e-5), "outs_2 mismatch"

    # TODO(synk): ActFun.backward (surrogate gradient) is not implemented;
    # this kernel covers the forward pass only.
    print("KERNEL_OK")
</pallas_src>

<mosaic_0001>
module attributes {stable_mosaic.version = 11 : i64} {
  func.func @_layer1_kernel(%arg0: i32, %arg1: memref<1x8x2312xbf16, #tpu.memory_space<vmem>>, %arg2: memref<2312x32xbf16, #tpu.memory_space<vmem>>, %arg3: memref<1x32xf32, #tpu.memory_space<vmem>>, %arg4: memref<1x8x32xf32, #tpu.memory_space<vmem>>) attributes {dimension_semantics = [#tpu.dimension_semantics<parallel>], iteration_bounds = array<i64: 10>, scalar_prefetch = 0 : i64, scratch_operands = 0 : i64, tpu.core_type = #tpu.core_type<tc>, window_params = [{transform_indices = @transform_0, window_bounds = array<i64: 1, 8, 2312>}, {pipeline_mode = #tpu.pipeline_mode<synchronous>, transform_indices = @transform_1, window_bounds = array<i64: 2312, 32>}, {pipeline_mode = #tpu.pipeline_mode<synchronous>, transform_indices = @transform_2, window_bounds = array<i64: 1, 32>}, {transform_indices = @transform_3, window_bounds = array<i64: 1, 8, 32>}]} {
    %c0 = arith.constant 0 : index
    %c0_0 = arith.constant 0 : index
    %c0_1 = arith.constant 0 : index
    %0 = vector.load %arg1[%c0, %c0_0, %c0_1] : memref<1x8x2312xbf16, #tpu.memory_space<vmem>>, vector<1x8x2312xbf16>
    %1 = vector.shape_cast %0 : vector<1x8x2312xbf16> to vector<8x2312xbf16>
    %c0_2 = arith.constant 0 : index
    %c0_3 = arith.constant 0 : index
    %2 = vector.load %arg2[%c0_2, %c0_3] : memref<2312x32xbf16, #tpu.memory_space<vmem>>, vector<2312x32xbf16>
    %cst = arith.constant dense<0.000000e+00> : vector<8x32xf32>
    %3 = tpu.matmul %1, %2, %cst {dimension_numbers = #tpu.dot_dimension_numbers<[1], [0], [0], [1], [0, 0, 1, 1], [], []>} : vector<8x2312xbf16>, vector<2312x32xbf16>, vector<8x32xf32> -> vector<8x32xf32>
    %c0_4 = arith.constant 0 : index
    %c0_5 = arith.constant 0 : index
    %4 = vector.load %arg3[%c0_4, %c0_5] : memref<1x32xf32, #tpu.memory_space<vmem>>, vector<1x32xf32>
    %5 = vector.broadcast %4 : vector<1x32xf32> to vector<8x32xf32>
    %6 = arith.addf %3, %5 : vector<8x32xf32>
    %c0_6 = arith.constant 0 : index
    %c0_7 = arith.constant 0 : index
    %c0_8 = arith.constant 0 : index
    %7 = vector.load %arg4[%c0_6, %c0_7, %c0_8] : memref<1x8x32xf32, #tpu.memory_space<vmem>>, vector<1x8x32xf32>
    %8 = vector.shape_cast %7 : vector<1x8x32xf32> to vector<8x32xf32>
    %9 = vector.shape_cast %6 : vector<8x32xf32> to vector<1x8x32xf32>
    tpu.vector_store %arg4[%c0_6, %c0_7, %c0_8], %9 {strides = array<i32>} : memref<1x8x32xf32, #tpu.memory_space<vmem>>, vector<1x8x32xf32>,
    return
  }
  func.func @transform_0(%arg0: i32) -> (i32, i32, i32) {
    %c0_i32 = arith.constant 0 : i32
    %c0_i32_0 = arith.constant 0 : i32
    %c0_i32_1 = arith.constant 0 : i32
    return %arg0, %c0_i32, %c0_i32_0 : i32, i32, i32
  }
  func.func @transform_1(%arg0: i32) -> (i32, i32) {
    %c0_i32 = arith.constant 0 : i32
    %c0_i32_0 = arith.constant 0 : i32
    %c0_i32_1 = arith.constant 0 : i32
    return %c0_i32, %c0_i32_0 : i32, i32
  }
  func.func @transform_2(%arg0: i32) -> (i32, i32) {
    %c0_i32 = arith.constant 0 : i32
    %c0_i32_0 = arith.constant 0 : i32
    %c0_i32_1 = arith.constant 0 : i32
    return %c0_i32, %c0_i32_0 : i32, i32
  }
  func.func @transform_3(%arg0: i32) -> (i32, i32, i32) {
    %c0_i32 = arith.constant 0 : i32
    %c0_i32_0 = arith.constant 0 : i32
    %c0_i32_1 = arith.constant 0 : i32
    return %arg0, %c0_i32, %c0_i32_0 : i32, i32, i32
  }
}

</mosaic_0001>

<bundles_post_ra>
// kernel: tpu_custom_call.1
= control target key start
LH: loop header
LB: loop body
LE: loop exit
PB: predicated region body
PF: predicated region fallthrough
CT: control target
= control target key end

     0   :  { %8 = vsyncpa [#allocation3], 0  ;;  %s3117_s0 = inlined_call_operand.vmem [shape: bf16[10,8,2312], index: 0, kind: input, shape index: {}]   ;;  %s3118_s1 = inlined_call_operand.vmem [shape: bf16[2312,32], index: 1, kind: input, shape index: {}]   ;;  %s3119_s2 = inlined_call_operand.vmem [shape: f32[1,32], index: 2, kind: input, shape index: {}]   ;;  %s3120_s3 = inlined_call_operand.hbm [shape: f32[10,8,32], index: 3, kind: output, shape index: {}]  }
   0x1   :  { %10 = vsyncpa [#allocation3 + $0x1], 0  ;;  %s2567_s12 = smov 0   ;;  %s2569_s13 = smov 0  }
   0x2   :  { %s2571_s14 = smov 0   ;;  %s2573_s15 = smov 0  }
   0x3 LB: > { %s2588_s16 = sadd.s32 4294967295, %s2542_s15   ;;  %s1892_s17 = sadd.s32 4294967294, %s2542_s15   ;;  %s2542_s15 = sphi %s2573_s15, %s3126_s15   ;;  %s2538_s14 = sphi %s2571_s14, %s3125_s14   ;;  %s2534_s13 = sphi %s2569_s13, %s3124_s13   ;;  %s2530_s12 = sphi %s2567_s12, %s3123_s12  }
   0x4   : > { %s2592_s18 = sadd.s32 1, %s2542_s15   ;;  %s91_s19 = sadd.s32 1, %s2538_s14 }
   0x5   : > { %s88_s20 = ssub.s32 %s2542_s15, %s2592_s18  ;;  %p101_p0 = scmp.ne.s32.totalorder %s2538_s14, %s2534_s13 }
   0x6   : > { %p89_p1 = scmp.eq.s32.totalorder %s88_s20, 0  ;;  %p102_p2 = scmp.eq.s32.totalorder %s2588_s16, 9 }
   0x7   : > { %p107_p3 = scmp.ne.s32.totalorder %s2534_s13, %s2530_s12  ;;  %p108_p4 = scmp.eq.s32.totalorder %s1892_s17, 9 }
   0x8   : > { %s2603_s21 = scalar_select %p89_p1, %s2538_s14, %s91_s19  }
   0x9   : > { %p2605_p5 = por %p102_p2, %p101_p0  ;;  %p2609_p6 = por %p108_p4, %p107_p3 }
   0xa   : > { %p1895_p7 = scmp.ge.s32.totalorder %s2542_s15, 1  ;;  %p140_p8 = scmp.lt.s32.totalorder %s2542_s15, 11 }
   0xc   : > { %p141_p9 = pnand %p1895_p7, %p140_p8 }
   0xd   : > { %v2316_v0 = vld [vmem:[%s3118_s1 + $0x40] sm:$0xff] (!%p141_p9)   ;;  %v2320_v4 = vld [vmem:[%s3118_s1 + $0x48] sm:$0xff] (!%p141_p9)   ;;  %v2324_v8 = vld [vmem:[%s3118_s1 + $0x50] sm:$0xff] (!%p141_p9)   ;;  %p164_p10 = scmp.lt.s32.totalorder (!%p141_p9), %s2588_s16, 9  ;;  %vm2545_vm0 = vmmov (!%p141_p9), 0   ;;  %vm1413_vm1 = vcmask (!%p141_p9), 1043456  }
   0xe   : > { %144 = sbr.rel (%p141_p9) target bundleno = 407 (0x197), region = 32  ;;  %v2317_v1 = vld [vmem:[%s3118_s1] sm:$0xff] (!%p141_p9)   ;;  %2068 = vmatprep.subr.bf16.mxu0 (!%p141_p9), %v2316_v0  ;;  %v2321_v5 = vld [vmem:[%s3118_s1 + $0x8] sm:$0xff] (!%p141_p9)   ;;  %v2325_v9 = vld [vmem:[%s3118_s1 + $0x10] sm:$0xff] (!%p141_p9)   ;;  %vm1409_vm2 = vcmask (!%p141_p9), 64512   ;;  %s161_s27 = sand.u32 (!%p141_p9), 1, %s2534_s13  }
   0xf   : > { %v2318_v2 = vld [vmem:[%s3118_s1 + $0xc0] sm:$0xff] (!%p141_p9)   ;;  %2069 = vmatpush3.bf16.msra.mxu0 (!%p141_p9), %v2317_v1  ;;  %v2322_v6 = vld [vmem:[%s3118_s1 + $0xc8] sm:$0xff] (!%p141_p9)   ;;  %v2326_v10 = vld [vmem:[%s3118_s1 + $0xd0] sm:$0xff] (!%p141_p9)   ;;  %s1896_s28 = sshll.u32 (!%p141_p9), %s161_s27, 3  ;;  %s2065_s29 = sshll.u32 (!%p141_p9), %s2588_s16, 7  ;;  %vm1817_vm3 = vcmask (!%p141_p9), 261120  }
  0x10   : > { %v2319_v3 = vld [vmem:[%s3118_s1 + $0x80] sm:$0xff] (!%p141_p9)   ;;  %2090 = vmatprep.subr.bf16.mxu1 (!%p141_p9), %v2318_v2  ;;  %2070 = vmatprep.subr.bf16.mxu0 (!%p141_p9), %v2320_v4  ;;  %v2323_v7 = vld [vmem:[%s3118_s1 + $0x88] sm:$0xff] (!%p141_p9)   ;;  %v2327_v11 = vld [vmem:[%s3118_s1 + $0x90] sm:$0xff] (!%p141_p9)   ;;  %s3075_s8 = scalar_lea.hbm (!%p141_p9), %s3120_s3, %s2065_s29  ;;  %s1820_s9 = scalar_lea.sflag (!%p141_p9), [#allocation3], %s161_s27 }
  0x11   : > { %2091 = vmatpush3.bf16.msra.mxu1 (!%p141_p9), %v2319_v3  ;;  %v2328_v12 = vld [vmem:[%s3118_s1 + $0x58] sm:$0xff] (!%p141_p9)   ;;  %v2332_v16 = vld [vmem:[%s3118_s1 + $0x60] sm:$0xff] (!%p141_p9)   ;;  %v2336_v20 = vld [vmem:[%s3118_s1 + $0x68] sm:$0xff] (!%p141_p9)  }
  0x12   : > { %2092 = vmatprep.subr.bf16.mxu1 (!%p141_p9), %v2322_v6  ;;  %v2329_v13 = vld [vmem:[%s3118_s1 + $0x18] sm:$0xff] (!%p141_p9)   ;;  %v2333_v17 = vld [vmem:[%s3118_s1 + $0x20] sm:$0xff] (!%p141_p9)   ;;  %v2337_v21 = vld [vmem:[%s3118_s1 + $0x28] sm:$0xff] (!%p141_p9)  }
  0x13   : > { %2071 = vmatpush3.bf16.msra.mxu0 (!%p141_p9), %v2321_v5  ;;  %v2330_v14 = vld [vmem:[%s3118_s1 + $0xd8] sm:$0xff] (!%p141_p9)   ;;  %v2334_v18 = vld [vmem:[%s3118_s1 + $0xe0] sm:$0xff] (!%p141_p9)   ;;  %v2338_v22 = vld [vmem:[%s3118_s1 + $0xe8] sm:$0xff] (!%p141_p9)  }
  0x14   : > { %2072 = vmatprep.subr.bf16.mxu0 (!%p141_p9), %v2324_v8  ;;  %v2331_v15 = vld [vmem:[%s3118_s1 + $0x98] sm:$0xff] (!%p141_p9)   ;;  %v2335_v19 = vld [vmem:[%s3118_s1 + $0xa0] sm:$0xff] (!%p141_p9)   ;;  %v2339_v23 = vld [vmem:[%s3118_s1 + $0xa8] sm:$0xff] (!%p141_p9)  }
  0x15   : > { %2093 = vmatpush3.bf16.msra.mxu1 %v2323_v7  ;;  %s165_s30 = scalar_select %p164_p10, %s2588_s16, 9  ;;  %v2340_v24 = vld [vmem:[%s3118_s1 + $0x70] sm:$0xff]   ;;  %v2344_v28 = vld [vmem:[%s3118_s1 + $0x78] sm:$0xff]   ;;  %v2350_v35 = vld [vmem:[%s3118_s1 + $0x140] sm:$0xff]  }
  0x16   : > { %2094 = vmatprep.subr.bf16.mxu1 %v2326_v10  ;;  %v2341_v25 = vld [vmem:[%s3118_s1 + $0x30] sm:$0xff]   ;;  %v2345_v29 = vld [vmem:[%s3118_s1 + $0x38] sm:$0xff]   ;;  %v2353_v39 = vld [vmem:[%s3118_s1 + $0x100] sm:$0xff]   ;;  %s2546_s16 = smov [#allocation2]  }
  0x17   : > { %2073 = vmatpush3.bf16.msra.mxu0 %v2325_v9  ;;  %s2274_s17 = smul.u32 76, %s165_s30  ;;  %v2342_v26 = vld [vmem:[%s3118_s1 + $0xf0] sm:$0xff]   ;;  %v2346_v30 = vld [vmem:[%s3118_s1 + $0xf8] sm:$0xff]   ;;  %v2354_v40 = vld [vmem:[%s3118_s1 + $0x1c0] sm:$0xff]   ;;  %s163_s30 = scalar_lea.vmem [#allocation2], %s1896_s28 }
  0x18   : > { %2074 = vmatprep.subr.bf16.mxu0 %v2328_v12  ;;  %v2343_v27 = vld [vmem:[%s3118_s1 + $0xb0] sm:$0xff]   ;;  %v2349_v34 = vld [vmem:[%s3118_s1 + $0xb8] sm:$0xff]   ;;  %v2355_v41 = vld [vmem:[%s3118_s1 + $0x180] sm:$0xff]   ;;  %s1833_s4 = sshll.u32 %s163_s30, 4  ;;  %s2484_s11 = sshll.u32 %s2546_s16, 4  ;;  %s3077_s4 = int_to_ptr.vmem [resolvable:$true] %s1833_s4  ;;  %s2485_s11 = int_to_ptr.vmem [resolvable:$false] %s2484_s11 }
  0x19   : > { %2095 = vmatpush3.bf16.msra.mxu1 %v2327_v11  ;;  %s2707_s5 = scalar_lea.vmem %s3117_s0, %s2274_s17  ;;  %v2356_v42 = vld [vmem:[%s3118_s1 + $0x148] sm:$0xff]   ;;  %v2360_v46 = vld [vmem:[%s3118_s1 + $0x150] sm:$0xff]   ;;  %v2364_v50 = vld [vmem:[%s3118_s1 + $0x158] sm:$0xff]   ;;  %s2480_s10 = scalar_lea.vmem %s3077_s4, 128 }
  0x1a   : > { %2096 = vmatprep.subr.bf16.mxu1 %v2330_v14  ;;  %v170_v31 = vld [vmem:[%s2707_s5] sm:$0xff]  ;;  %v171_v36 = vld [vmem:[%s2707_s5 + $0x8] sm:$0xff]  ;;  %v2361_v47 = vld [vmem:[%s3118_s1 + $0x110] sm:$0xff]   ;;  %p2481_p11 = scmp.ne.s32.totalorder %s3077_s4, %s2480_s10  ;;  %s2486_s17 = scalar_lea.vmem %s2485_s11, 256 }
  0x1b   : > { %2075 = vmatpush3.bf16.msra.mxu0 %v2329_v13  ;;  %v1899_v32 = vcombine.low %v170_v31, %v170_v31  ;;  %v1900_v33 = vcombine.high %v170_v31, %v170_v31  ;;  %v1901_v37 = vcombine.low %v171_v36, %v171_v36  ;;  %v1902_v38 = vcombine.high %v171_v36, %v171_v36  ;;  %v2357_v43 = vld [vmem:[%s3118_s1 + $0x108] sm:$0xff]   ;;  %v2362_v48 = vld [vmem:[%s3118_s1 + $0x1d0] sm:$0xff]   ;;  %v2365_v51 = vld [vmem:[%s3118_s1 + $0x118] sm:$0xff]   ;;  %p2487_p0 = scmp.lt.s32.totalorder %s3077_s4, %s2485_s11  ;;  %p2488_p1 = scmp.lt.s32.totalorder %s2486_s17, %s2480_s10 }
  0x1c   : > { %2076 = vmatprep.subr.bf16.mxu0 %v2332_v16  ;;  %v2358_v44 = vld [vmem:[%s3118_s1 + $0x1c8] sm:$0xff]   ;;  %v2363_v49 = vld [vmem:[%s3118_s1 + $0x190] sm:$0xff]   ;;  %v2366_v52 = vld [vmem:[%s3118_s1 + $0x1d8] sm:$0xff]   ;;  %p2482_p12 = pnand %p2481_p11, %p2605_p5 }
  0x1d   : > { %2097 = vmatpush3.bf16.msra.mxu1 %v2331_v15  ;;  %1449 = vmatprep.mubr.bf16.mxu0 %v1900_v33  ;;  %v2359_v45 = vld [vmem:[%s3118_s1 + $0x188] sm:$0xff]   ;;  %v2367_v53 = vld [vmem:[%s3118_s1 + $0x198] sm:$0xff]   ;;  %v2368_v54 = vld [vmem:[%s3118_s1 + $0x160] sm:$0xff]   ;;  %p2489_p2 = por %p2488_p1, %p2487_p0 }
  0x1e   : > { %2098 = vmatprep.subr.bf16.mxu1 %v2334_v18  ;;  %1489 = vmatprep.mubr.bf16.mxu1 %v1902_v38  ;;  %v2369_v55 = vld [vmem:[%s3118_s1 + $0x120] sm:$0xff]   ;;  %v2372_v58 = vld [vmem:[%s3118_s1 + $0x168] sm:$0xff]   ;;  %v2376_v62 = vld [vmem:[%s3118_s1 + $0x170] sm:$0xff]   ;;  %p2483_p13 = pneg %p2482_p12 }
  0x1f   : > { %2077 = vmatpush3.bf16.msra.mxu0 %v2333_v17  ;;  %v2370_v56 = vld [vmem:[%s3118_s1 + $0x1e0] sm:$0xff]   ;;  %v2373_v59 = vld [vmem:[%s3118_s1 + $0x128] sm:$0xff]   ;;  %v2377_v63 = vld [vmem:[%s3118_s1 + $0x130] sm:$0xff]  }
  0x20   : > { %2078 = vmatprep.subr.bf16.mxu0 %v2336_v20  ;;  %v2371_v57 = vld [vmem:[%s3118_s1 + $0x1a0] sm:$0xff]   ;;  %v2374_v60 = vld [vmem:[%s3118_s1 + $0x1e8] sm:$0xff]   ;;  %v2378_v0 = vld [vmem:[%s3118_s1 + $0x1f0] sm:$0xff]   ;;  %p2490_p3 = pnand %p2489_p2, %p2483_p13 }
  0x21   : > { %2099 = vmatpush3.bf16.msra.mxu1 %v2335_v19  ;;  %v2375_v61 = vld [vmem:[%s3118_s1 + $0x1a8] sm:$0xff]   ;;  %v2379_v1 = vld [vmem:[%s3118_s1 + $0x1b0] sm:$0xff]   ;;  %v2380_v2 = vld [vmem:[%s3118_s1 + $0x178] sm:$0xff]  }
  0x22   : > { %2100 = vmatprep.subr.bf16.mxu1 %v2338_v22  ;;  %v2381_v3 = vld [vmem:[%s3118_s1 + $0x138] sm:$0xff]   ;;  %v172_v5 = vld [vmem:[%s2707_s5 + $0x10] sm:$0xff]  ;;  %v2386_v9 = vld [vmem:[%s3118_s1 + $0x240] sm:$0xff]  }
  0x23   : > { %2079 = vmatpush3.bf16.msra.mxu0 %v2337_v21  ;;  %v2382_v4 = vld [vmem:[%s3118_s1 + $0x1f8] sm:$0xff]   ;;  %v1903_v6 = vcombine.low %v172_v5, %v172_v5  ;;  %v1904_v7 = vcombine.high %v172_v5, %v172_v5  ;;  %v2389_v13 = vld [vmem:[%s3118_s1 + $0x200] sm:$0xff]   ;;  %v2392_v16 = vld [vmem:[%s3118_s1 + $0x248] sm:$0xff]  }
  0x24   : > { %2080 = vmatprep.subr.bf16.mxu0 %v2340_v24  ;;  %v2385_v8 = vld [vmem:[%s3118_s1 + $0x1b8] sm:$0xff]   ;;  %v2390_v14 = vld [vmem:[%s3118_s1 + $0x2c0] sm:$0xff]   ;;  %v2393_v17 = vld [vmem:[%s3118_s1 + $0x208] sm:$0xff]  }
  0x25   : > { %2101 = vmatpush3.bf16.msra.mxu1 %v2339_v23  ;;  %v173_v10 = vld [vmem:[%s2707_s5 + $0x18] sm:$0xff]  ;;  %v2391_v15 = vld [vmem:[%s3118_s1 + $0x280] sm:$0xff]   ;;  %v2394_v18 = vld [vmem:[%s3118_s1 + $0x2c8] sm:$0xff]  }
  0x26   : > { %2102 = vmatprep.subr.bf16.mxu1 %v2342_v26  ;;  %v1905_v11 = vcombine.low %v173_v10, %v173_v10  ;;  %v1906_v12 = vcombine.high %v173_v10, %v173_v10  ;;  %v2395_v19 = vld [vmem:[%s3118_s1 + $0x288] sm:$0xff]   ;;  %v2396_v20 = vld [vmem:[%s3118_s1 + $0x250] sm:$0xff]   ;;  %v2400_v24 = vld [vmem:[%s3118_s1 + $0x258] sm:$0xff]  }
  0x27   : > { %2081 = vmatpush3.bf16.msra.mxu0 %v2341_v25  ;;  %v2397_v21 = vld [vmem:[%s3118_s1 + $0x210] sm:$0xff]   ;;  %v2401_v25 = vld [vmem:[%s3118_s1 + $0x218] sm:$0xff]   ;;  %v2407_v31 = vld [vmem:[%s3118_s1 + $0x2a0] sm:$0xff]  }
  0x28   : > { %2082 = vmatprep.subr.bf16.mxu0 %v2344_v28  ;;  %v2398_v22 = vld [vmem:[%s3118_s1 + $0x2d0] sm:$0xff]   ;;  %v2402_v26 = vld [vmem:[%s3118_s1 + $0x2d8] sm:$0xff]   ;;  %v2404_v28 = vld [vmem:[%s3118_s1 + $0x260] sm:$0xff]  }
  0x29   : > { %2103 = vmatpush3.bf16.msra.mxu1 %v2343_v27  ;;  %v2399_v23 = vld [vmem:[%s3118_s1 + $0x290] sm:$0xff]   ;;  %v2403_v27 = vld [vmem:[%s3118_s1 + $0x298] sm:$0xff]   ;;  %v2409_v33 = vld [vmem:[%s3118_s1 + $0x228] sm:$0xff]  }
  0x2a   : > { %2104 = vmatprep.subr.bf16.mxu1 %v2346_v30  ;;  %v2406_v30 = vld [vmem:[%s3118_s1 + $0x2e0] sm:$0xff]   ;;  %v2412_v36 = vld [vmem:[%s3118_s1 + $0x270] sm:$0xff]  }
  0x2b   : > { %2083 = vmatpush3.bf16.msra.mxu0 %v2345_v29  ;;  %v2405_v29 = vld [vmem:[%s3118_s1 + $0x220] sm:$0xff]   ;;  %v2414_v38 = vld [vmem:[%s3118_s1 + $0x2f0] sm:$0xff]  }
  0x2c   : > { %2112 = vmatprep.subr.bf16.mxu0 %v2350_v35  ;;  %v2411_v35 = vld [vmem:[%s3118_s1 + $0x2a8] sm:$0xff]   ;;  %v2443_v5 = vld [vmem:[%s3118_s1 + $0x3a0] sm:$0xff]   ;;  %v2448_v10 = vld [vmem:[%s3118_s1 + $0x370] sm:$0xff]  }
  0x2d   : > { %2105 = vmatpush3.bf16.msra.mxu1 %v2349_v34  ;;  %v2410_v34 = vld [vmem:[%s3118_s1 + $0x2e8] sm:$0xff]  }
  0x2e   : > { %1450 = vmatmul.mubr.bf16.vlgmr.msra.gmra.mrb[0].mxu0 %v1899_v32  ;;  %2134 = vmatprep.subr.bf16.mxu1 %v2354_v40  ;;  %v2408_v32 = vld [vmem:[%s3118_s1 + $0x268] sm:$0xff]   ;;  %v2416_v40 = vld [vmem:[%s3118_s1 + $0x278] sm:$0xff]  }
  0x2f   : > { %2113 = vmatpush3.bf16.msra.mxu0 %v2353_v39  ;;  %1529 = vmatprep.mubr.bf16.mxu0 %v1904_v7  ;;  %v2415_v39 = vld [vmem:[%s3118_s1 + $0x2b0] sm:$0xff]   ;;  %v2445_v7 = vld [vmem:[%s3118_s1 + $0x328] sm:$0xff]  }
  0x30   : > { %1490 = vmatmul.mubr.bf16.vlgmr.msra.gmra.mrb[0].mxu1 %v1901_v37  ;;  %2114 = vmatprep.subr.bf16.mxu0 %v2356_v42  ;;  %v2413_v37 = vld [vmem:[%s3118_s1 + $0x230] sm:$0xff]   ;;  %v2418_v42 = vld [vmem:[%s3118_s1 + $0x2f8] sm:$0xff]  }
  0x31   : > { %2135 = vmatpush3.bf16.msra.mxu1 %v2355_v41  ;;  %1569 = vmatprep.mubr.bf16.mxu1 %v1906_v12  ;;  %v2417_v41 = vld [vmem:[%s3118_s1 + $0x238] sm:$0xff]   ;;  %v2450_v12 = vld [vmem:[%s3118_s1 + $0x3f0] sm:$0xff]  }
  0x32   : > { %2136 = vmatprep.subr.bf16.mxu1 %v2358_v44 }
  0x33   : > { %2115 = vmatpush3.bf16.msra.mxu0 %v2357_v43  ;;  %v174_v43 = vld [vmem:[%s2707_s5 + $0x20] sm:$0xff] }
  0x34   : > { %2116 = vmatprep.subr.bf16.mxu0 %v2360_v46  ;;  %v1907_v44 = vcombine.low %v174_v43, %v174_v43  ;;  %v2421_v46 = vld [vmem:[%s3118_s1 + $0x2b8] sm:$0xff]  }
  0x35   : > { %2137 = vmatpush3.bf16.msra.mxu1 %v2359_v45  ;;  %v1908_v45 = vcombine.high %v174_v43, %v174_v43  ;;  %v2473_v43 = vld [vmem:[%s3118_s1 + $0x430] sm:$0xff]  }
  0x36   : > { %2138 = vmatprep.subr.bf16.mxu1 %v2362_v48  ;;  %v175_v48 = vld [vmem:[%s2707_s5 + $0x28] sm:$0xff] }
  0x37   : > { %2117 = vmatpush3.bf16.msra.mxu0 %v2361_v47  ;;  %v2422_v47 = vld [vmem:[%s3118_s1 + $0x340] sm:$0xff]  }
  0x38   : > { %2118 = vmatprep.subr.bf16.mxu0 %v2364_v50  ;;  %v1910_v50 = vcombine.high %v175_v48, %v175_v48 }
  0x39   : > { %2139 = vmatpush3.bf16.msra.mxu1 %v2363_v49  ;;  %v1909_v49 = vcombine.low %v175_v48, %v175_v48  ;;  %v1898_v48 = vld [vmem:[%s3119_s2] ss:$0 sm:$0xff] }
  0x3a   : > { %2140 = vmatprep.subr.bf16.mxu1 %v2366_v52  ;;  %v2426_v52 = vld [vmem:[%s3118_s1 + $0x3c0] sm:$0xff]  }
  0x3b   : > { %2119 = vmatpush3.bf16.msra.mxu0 %v2365_v51  ;;  %v2425_v51 = vld [vmem:[%s3118_s1 + $0x300] sm:$0xff]  }
  0x3c   : > { %2120 = vmatprep.subr.bf16.mxu0 %v2368_v54  ;;  %v2428_v54 = vld [vmem:[%s3118_s1 + $0x348] sm:$0xff]  }
  0x3d   : > { %2141 = vmatpush3.bf16.msra.mxu1 %v2367_v53  ;;  %v2427_v53 = vld [vmem:[%s3118_s1 + $0x380] sm:$0xff]  }
  0x3e   : > { %2142 = vmatprep.subr.bf16.mxu1 %v2370_v56  ;;  %v2430_v56 = vld [vmem:[%s3118_s1 + $0x3c8] sm:$0xff]  }
  0x3f   : > { %2121 = vmatpush3.bf16.msra.mxu0 %v2369_v55  ;;  %v2429_v55 = vld [vmem:[%s3118_s1 + $0x308] sm:$0xff]  }
  0x40   : > { %2122 = vmatprep.subr.bf16.mxu0 %v2372_v58  ;;  %v2432_v58 = vld [vmem:[%s3118_s1 + $0x350] sm:$0xff]  }
  0x41   : > { %2143 = vmatpush3.bf16.msra.mxu1 %v2371_v57  ;;  %v2431_v57 = vld [vmem:[%s3118_s1 + $0x388] sm:$0xff]  }
  0x42   : > { %2144 = vmatprep.subr.bf16.mxu1 %v2374_v60  ;;  %v2434_v60 = vld [vmem:[%s3118_s1 + $0x3d0] sm:$0xff]  }
  0x43   : > { %2123 = vmatpush3.bf16.msra.mxu0 %v2373_v59  ;;  %v2433_v59 = vld [vmem:[%s3118_s1 + $0x310] sm:$0xff]  }
  0x44   : > { %2124 = vmatprep.subr.bf16.mxu0 %v2376_v62  ;;  %v2436_v62 = vld [vmem:[%s3118_s1 + $0x358] sm:$0xff]  }
  0x45   : > { %2145 = vmatpush3.bf16.msra.mxu1 %v2375_v61  ;;  %v2435_v61 = vld [vmem:[%s3118_s1 + $0x390] sm:$0xff]  }
  0x46   : > { %2146 = vmatprep.subr.bf16.mxu1 %v2378_v0  ;;  %v2438_v0 = vld [vmem:[%s3118_s1 + $0x3d8] sm:$0xff]  }
  0x47   : > { %2125 = vmatpush3.bf16.msra.mxu0 %v2377_v63  ;;  %v2437_v63 = vld [vmem:[%s3118_s1 + $0x318] sm:$0xff]  }
  0x48   : > { %2126 = vmatprep.subr.bf16.mxu0 %v2380_v2  ;;  %v2440_v2 = vld [vmem:[%s3118_s1 + $0x360] sm:$0xff]  }
  0x49   : > { %2147 = vmatpush3.bf16.msra.mxu1 %v2379_v1  ;;  %v2439_v1 = vld [vmem:[%s3118_s1 + $0x398] sm:$0xff]  }
  0x4a   : > { %2148 = vmatprep.subr.bf16.mxu1 %v2382_v4  ;;  %v2442_v4 = vld [vmem:[%s3118_s1 + $0x3e0] sm:$0xff]  }
  0x4b   : > { %2127 = vmatpush3.bf16.msra.mxu0 %v2381_v3  ;;  %v2441_v3 = vld [vmem:[%s3118_s1 + $0x320] sm:$0xff]  }
  0x4c   : > { %2156 = vmatprep.subr.bf16.mxu0 %v2386_v9  ;;  %v2447_v9 = vld [vmem:[%s3118_s1 + $0x3a8] sm:$0xff]  }
  0x4d   : > { %2149 = vmatpush3.bf16.msra.mxu1 %v2385_v8  ;;  %v2446_v8 = vld [vmem:[%s3118_s1 + $0x3e8] sm:$0xff]  }
  0x4e   : > { %1530 = vmatmul.mubr.bf16.vlgmr.msra.gmra.mrb[4].mxu0 %v1903_v6  ;;  %2178 = vmatprep.subr.bf16.mxu1 %v2390_v14  ;;  %v2444_v6 = vld [vmem:[%s3118_s1 + $0x368] sm:$0xff]   ;;  %v2452_v14 = vld [vmem:[%s3118_s1 + $0x378] sm:$0xff]  }
  0x4f   : > { %2157 = vmatpush3.bf16.msra.mxu0 %v2389_v13  ;;  %1609 = vmatprep.mubr.bf16.mxu0 %v1908_v45  ;;  %v2451_v13 = vld [vmem:[%s3118_s1 + $0x3b0] sm:$0xff]   ;;  %v2475_v45 = vld [vmem:[%s3118_s1 + $0x438] sm:$0xff]  }
  0x50   : > { %1570 = vmatmul.mubr.bf16.vlgmr.msra.gmra.mrb[4].mxu1 %v1905_v11  ;;  %2158 = vmatprep.subr.bf16.mxu0 %v2392_v16  ;;  %v2449_v11 = vld [vmem:[%s3118_s1 + $0x330] sm:$0xff]   ;;  %v2454_v16 = vld [vmem:[%s3118_s1 + $0x3f8] sm:$0xff]  }
  0x51   : > { %2179 = vmatpush3.bf16.msra.mxu1 %v2391_v15  ;;  %1649 = vmatprep.mubr.bf16.mxu1 %v1910_v50  ;;  %v2453_v15 = vld [vmem:[%s3118_s1 + $0x338] sm:$0xff]  }
  0x52   : > { %2180 = vmatprep.subr.bf16.mxu1 %v2394_v18 }
  0x53   : > { %2159 = vmatpush3.bf16.msra.mxu0 %v2393_v17  ;;  %v176_v17 = vld [vmem:[%s2707_s5 + $0x30] sm:$0xff] }
  0x54   : > { %2160 = vmatprep.subr.bf16.mxu0 %v2396_v20  ;;  %v1911_v18 = vcombine.low %v176_v17, %v176_v17  ;;  %v2457_v20 = vld [vmem:[%s3118_s1 + $0x3b8] sm:$0xff]  }
  0x55   : > { %2181 = vmatpush3.bf16.msra.mxu1 %v2395_v19  ;;  %v1912_v19 = vcombine.high %v176_v17, %v176_v17 }
  0x56   : > { %2182 = vmatprep.subr.bf16.mxu1 %v2398_v22  ;;  %v177_v22 = vld [vmem:[%s2707_s5 + $0x38] sm:$0xff] }
  0x57   : > { %2161 = vmatpush3.bf16.msra.mxu0 %v2397_v21  ;;  %v2458_v21 = vld [vmem:[%s3118_s1 + $0x440] sm:$0xff]  }
  0x58   : > { %2162 = vmatprep.subr.bf16.mxu0 %v2400_v24  ;;  %v1914_v24 = vcombine.high %v177_v22, %v177_v22 }
  0x59   : > { %2183 = vmatpush3.bf16.msra.mxu1 %v2399_v23  ;;  %v1913_v23 = vcombine.low %v177_v22, %v177_v22 }
  0x5a   : > { %2184 = vmatprep.subr.bf16.mxu1 %v2402_v26  ;;  %v2462_v26 = vld [vmem:[%s3118_s1 + $0x448] sm:$0xff]  }
  0x5b   : > { %2163 = vmatpush3.bf16.msra.mxu0 %v2401_v25  ;;  %v2461_v25 = vld [vmem:[%s3118_s1 + $0x400] sm:$0xff]  }
  0x5c   : > { %2164 = vmatprep.subr.bf16.mxu0 %v2404_v28  ;;  %v2464_v28 = vld [vmem:[%s3118_s1 + $0x450] sm:$0xff]  }
  0x5d   : > { %2185 = vmatpush3.bf16.msra.mxu1 %v2403_v27  ;;  %v2463_v27 = vld [vmem:[%s3118_s1 + $0x408] sm:$0xff]  }
  0x5e   : > { %2186 = vmatprep.subr.bf16.mxu1 %v2406_v30  ;;  %v2465_v30 = vld [vmem:[%s3118_s1 + $0x410] sm:$0xff]  }
  0x5f   : > { %2165 = vmatpush3.bf16.msra.mxu0 %v2405_v29  ;;  %v2544_v29 = vmov 0.0  }
  0x60   : > { %2166 = vmatprep.subr.bf16.mxu0 %v2408_v32  ;;  %v2467_v32 = vld [vmem:[%s3118_s1 + $0x418] sm:$0xff]  }
  0x61   : > { %2187 = vmatpush3.bf16.msra.mxu1 %v2407_v31  ;;  %v2466_v31 = vld [vmem:[%s3118_s1 + $0x458] sm:$0xff]  }
  0x62   : > { %2188 = vmatprep.subr.bf16.mxu1 %v2410_v34  ;;  %v2469_v34 = vld [vmem:[%s3118_s1 + $0x420] sm:$0xff]  }
  0x63   : > { %2167 = vmatpush3.bf16.msra.mxu0 %v2409_v33  ;;  %v2468_v33 = vld [vmem:[%s3118_s1 + $0x460] sm:$0xff]  }
  0x64   : > { %2168 = vmatprep.subr.bf16.mxu0 %v2412_v36  ;;  %v2476_v36 = vld [vmem:[%s3118_s1 + $0x480] ss:$0 sps:$4 sm:$0xff]  }
  0x65   : > { %2189 = vmatpush3.bf16.msra.mxu1 %v2411_v35  ;;  %v2470_v35 = vld [vmem:[%s3118_s1 + $0x468] sm:$0xff]  }
  0x66   : > { %2190 = vmatprep.subr.bf16.mxu1 %v2414_v38 }
  0x67   : > { %2169 = vmatpush3.bf16.msra.mxu0 %v2413_v37  ;;  %v178_v37 = vld [vmem:[%s2707_s5 + $0x40] sm:$0xff] }
  0x68   : > { %2170 = vmatprep.subr.bf16.mxu0 %v2416_v40  ;;  %v1916_v38 = vcombine.high %v178_v37, %v178_v37  ;;  %v2479_v40 = vld [vmem:[%s2707_s5 + $0x48] ss:$0 sps:$4 sm:$0xff]  }
  0x69   : > { %2191 = vmatpush3.bf16.msra.mxu1 %v2415_v39  ;;  %v1415_v39 = vsel %vm1413_vm1, %v2476_v36, 0 }
  0x6a   : > { %2192 = vmatprep.subr.bf16.mxu1 %v2418_v42  ;;  %v2472_v42 = vld [vmem:[%s3118_s1 + $0x470] sm:$0xff]  }
  0x6b   : > { %2171 = vmatpush3.bf16.msra.mxu0 %v2417_v41  ;;  %v2471_v41 = vld [vmem:[%s3118_s1 + $0x428] sm:$0xff]  }
  0x6c   : > { %2200 = vmatprep.subr.bf16.mxu0 %v2422_v47 }
  0x6d   : > { %2193 = vmatpush3.bf16.msra.mxu1 %v2421_v46  ;;  %v1915_v46 = vcombine.low %v178_v37, %v178_v37 }
  0x6e   : > { %1610 = vmatmul.mubr.bf16.vlgmr.msra.gmra.mrb[8].mxu0 %v1907_v44  ;;  %2222 = vmatprep.subr.bf16.mxu1 %v2426_v52  ;;  %v2474_v44 = vld [vmem:[%s3118_s1 + $0x478] sm:$0xff]  }
  0x6f   : > { %2201 = vmatpush3.bf16.msra.mxu0 %v2425_v51  ;;  %1689 = vmatprep.mubr.bf16.mxu0 %v1912_v19 }
  0x70   : > { %1650 = vmatmul.mubr.bf16.vlgmr.msra.gmra.mrb[8].mxu1 %v1909_v49  ;;  %2202 = vmatprep.subr.bf16.mxu0 %v2428_v54 }
  0x71   : > { %2223 = vmatpush3.bf16.msra.mxu1 %v2427_v53  ;;  %1729 = vmatprep.mubr.bf16.mxu1 %v1914_v24 }
  0x72   : > { %2224 = vmatprep.subr.bf16.mxu1 %v2430_v56 }
  0x73   : > { %2203 = vmatpush3.bf16.msra.mxu0 %v2429_v55 }
  0x74   : > { %2204 = vmatprep.subr.bf16.mxu0 %v2432_v58 }
  0x75   : > { %2225 = vmatpush3.bf16.msra.mxu1 %v2431_v57 }
  0x76   : > { %2226 = vmatprep.subr.bf16.mxu1 %v2434_v60 }
  0x77   : > { %2205 = vmatpush3.bf16.msra.mxu0 %v2433_v59 }
  0x78   : > { %2206 = vmatprep.subr.bf16.mxu0 %v2436_v62 }
  0x79   : > { %2227 = vmatpush3.bf16.msra.mxu1 %v2435_v61 }
  0x7a   : > { %2228 = vmatprep.subr.bf16.mxu1 %v2438_v0 }
  0x7b   : > { %2207 = vmatpush3.bf16.msra.mxu0 %v2437_v63 }
  0x7c   : > { %2208 = vmatprep.subr.bf16.mxu0 %v2440_v2 }
  0x7d   : > { %2229 = vmatpush3.bf16.msra.mxu1 %v2439_v1 }
  0x7e   : > { %2230 = vmatprep.subr.bf16.mxu1 %v2442_v4 }
  0x7f   : > { %2209 = vmatpush3.bf16.msra.mxu0 %v2441_v3 }
  0x80   : > { %2210 = vmatprep.subr.bf16.mxu0 %v2444_v6 }
  0x81   : > { %2231 = vmatpush3.bf16.msra.mxu1 %v2443_v5 }
  0x82   : > { %2232 = vmatprep.subr.bf16.mxu1 %v2446_v8 }
  0x83   : > { %2211 = vmatpush3.bf16.msra.mxu0 %v2445_v7 }
  0x84   : > { %2212 = vmatprep.subr.bf16.mxu0 %v2448_v10 }
  0x85   : > { %2233 = vmatpush3.bf16.msra.mxu1 %v2447_v9 }
  0x86   : > { %2234 = vmatprep.subr.bf16.mxu1 %v2450_v12 }
  0x87   : > { %2213 = vmatpush3.bf16.msra.mxu0 %v2449_v11 }
  0x88   : > { %2214 = vmatprep.subr.bf16.mxu0 %v2452_v14 }
  0x89   : > { %2235 = vmatpush3.bf16.msra.mxu1 %v2451_v13 }
  0x8a   : > { %2236 = vmatprep.subr.bf16.mxu1 %v2454_v16 }
  0x8b   : > { %2215 = vmatpush3.bf16.msra.mxu0 %v2453_v15 }
  0x8c   : > { %2244 = vmatprep.subr.bf16.mxu0 %v2458_v21 }
  0x8d   : > { %2237 = vmatpush3.bf16.msra.mxu1 %v2457_v20 }
  0x8e   : > { %1690 = vmatmul.mubr.bf16.vlgmr.msra.gmra.mrb[12].mxu0 %v1911_v18  ;;  %2268 = vmatprep.subr.bf16.mxu1 %v2544_v29 }
  0x8f   : > { %2245 = vmatpush3.bf16.msra.mxu0 %v2461_v25  ;;  %1769 = vmatprep.mubr.bf16.mxu0 %v1916_v38 }
  0x90   : > { %1730 = vmatmul.mubr.bf16.vlgmr.msra.gmra.mrb[12].mxu1 %v1913_v23  ;;  %2246 = vmatprep.subr.bf16.mxu0 %v2462_v26 }
  0x91   : > { %2270 = vmatprep.mubr.msk.bf16.mxu1 %vm2545_vm0, %v2544_v29  ;;  %2269 = vmatpush3.bf16.msra.mxu1 %v1415_v39 }
  0x93   : > { %2247 = vmatpush3.bf16.msra.mxu0 %v2463_v27 }
  0x94   : > { %2248 = vmatprep.subr.bf16.mxu0 %v2464_v28 }
  0x97   : > { %2249 = vmatpush3.bf16.msra.mxu0 %v2465_v30 }
  0x98   : > { %2250 = vmatprep.subr.bf16.mxu0 %v2466_v31  ;;  %2271 = vmatmul.mubr.msk.bf16.vlgmr.msra.gmra.mrb[16].mxu1 %vm1409_vm2, %v2479_v40 }
  0x9b   : > { %2251 = vmatpush3.bf16.msra.mxu0 %v2467_v32 }
  0x9c   : > { %2252 = vmatprep.subr.bf16.mxu0 %v2468_v33 }
  0x9f   : > { %2253 = vmatpush3.bf16.msra.mxu0 %v2469_v34 }
  0xa0   : > { %2254 = vmatprep.subr.bf16.mxu0 %v2470_v35 }
  0xa3   : > { %2255 = vmatpush3.bf16.msra.mxu0 %v2471_v41 }
  0xa4   : > { %2256 = vmatprep.subr.bf16.mxu0 %v2472_v42 }
  0xa7   : > { %2257 = vmatpush3.bf16.msra.mxu0 %v2473_v43 }
  0xa8   : > { %2258 = vmatprep.subr.bf16.mxu0 %v2474_v44 }
  0xab   : > { %2259 = vmatpush3.bf16.msra.mxu0 %v2475_v45 }
  0xae   : > { %1770 = vmatmul.mubr.bf16.vlgmr.msra.gmra.mrb[16].mxu0 %v1915_v46 }
 0x101   : > { %v2084_v47 = vpop.f32.mrb[0].mxu0 }
 0x102   : > { %v2085_v49 = vpop.f32.mrb[1].mxu0 }
 0x103   : > { %v2086_v50 = vadd.f32 %v2085_v49, %v2084_v47  ;;  %v2087_v51 = vpop.f32.mrb[2].mxu0  ;;  %v2106_v52 = vpop.f32.mrb[0].mxu1 }
 0x104   : > { %v2088_v53 = vpop.f32.mrb[3].mxu0  ;;  %v2107_v54 = vpop.f32.mrb[1].mxu1 }
 0x105   : > { %v1452_v55 = vadd.f32 %v2086_v50, %v1898_v48  ;;  %v2108_v56 = vadd.f32 %v2107_v54, %v2106_v52  ;;  %v2109_v57 = vpop.f32.mrb[2].mxu1 }
 0x106   : > { %v2110_v58 = vpop.f32.mrb[3].mxu1 }
 0x107   : > { %v1492_v59 = vadd.f32 %v2108_v56, %v1452_v55 }
 0x121   : > { %v2128_v60 = vpop.f32.mrb[4].mxu0 }
 0x122   : > { %v2129_v61 = vpop.f32.mrb[5].mxu0 }
 0x123   : > { %v2130_v62 = vadd.f32 %v2129_v61, %v2128_v60  ;;  %v2131_v63 = vpop.f32.mrb[6].mxu0  ;;  %v2150_v0 = vpop.f32.mrb[4].mxu1 }
 0x124   : > { %v2132_v1 = vpop.f32.mrb[7].mxu0  ;;  %v2151_v3 = vpop.f32.mrb[5].mxu1 }
 0x125   : > { %v1532_v2 = vadd.f32 %v2130_v62, %v1492_v59  ;;  %v2152_v4 = vadd.f32 %v2151_v3, %v2150_v0  ;;  %v2153_v5 = vpop.f32.mrb[6].mxu1 }
 0x126   : > { %v2154_v6 = vpop.f32.mrb[7].mxu1 }
 0x127   : > { %v1572_v7 = vadd.f32 %v2152_v4, %v1532_v2 }
 0x141   : > { %v2172_v8 = vpop.f32.mrb[8].mxu0 }
 0x142   : > { %v2173_v9 = vpop.f32.mrb[9].mxu0 }
 0x143   : > { %v2174_v10 = vadd.f32 %v2173_v9, %v2172_v8  ;;  %v2175_v11 = vpop.f32.mrb[10].mxu0  ;;  %v2194_v12 = vpop.f32.mrb[8].mxu1 }
 0x144   : > { %v2176_v13 = vpop.f32.mrb[11].mxu0  ;;  %v2195_v14 = vpop.f32.mrb[9].mxu1 }
 0x145   : > { %v1612_v15 = vadd.f32 %v2174_v10, %v1572_v7  ;;  %v2196_v16 = vadd.f32 %v2195_v14, %v2194_v12  ;;  %v2197_v17 = vpop.f32.mrb[10].mxu1 }
 0x146   : > { %v2198_v18 = vpop.f32.mrb[11].mxu1 }
 0x147   : > { %v1652_v19 = vadd.f32 %v2196_v16, %v1612_v15 }
 0x161   : > { %v2216_v20 = vpop.f32.mrb[12].mxu0 }
 0x162   : > { %v2217_v21 = vpop.f32.mrb[13].mxu0 }
 0x163   : > { %v2218_v22 = vadd.f32 %v2217_v21, %v2216_v20  ;;  %v2219_v23 = vpop.f32.mrb[14].mxu0  ;;  %v2238_v24 = vpop.f32.mrb[12].mxu1 }
 0x164   : > { %v2220_v25 = vpop.f32.mrb[15].mxu0  ;;  %v2239_v26 = vpop.f32.mrb[13].mxu1 }
 0x165   : > { %v1692_v27 = vadd.f32 %v2218_v22, %v1652_v19  ;;  %v2240_v28 = vadd.f32 %v2239_v26, %v2238_v24  ;;  %v2241_v29 = vpop.f32.mrb[14].mxu1 }
 0x166   : > { %v2242_v30 = vpop.f32.mrb[15].mxu1 }
 0x167   : > { %v1732_v31 = vadd.f32 %v2240_v28, %v1692_v27 }
 0x16b   : > { %v1811_v32 = vpop.f32.mrb[16].mxu1 }
 0x16c   : > { %v2272_v33 = vpop.f32.mrb[17].mxu1 }
 0x16d   : > { %v1814_v34 = vpop.f32.mrb[18].mxu1 }
 0x16e   : > { %v2273_v35 = vpop.f32.mrb[19].mxu1 }
 0x181   : > { %v2260_v36 = vpop.f32.mrb[16].mxu0 }
 0x182   : > { %v2261_v37 = vpop.f32.mrb[17].mxu0 }
 0x183   : > { %v2262_v38 = vadd.f32 %v2261_v37, %v2260_v36  ;;  %v2263_v39 = vpop.f32.mrb[18].mxu0 }
 0x184   : > { %v2264_v40 = vpop.f32.mrb[19].mxu0 }
 0x185   : > { %v1772_v41 = vadd.f32 %v2262_v38, %v1732_v31 }
 0x187   : > { %v1812_v42 = vadd.f32 %v1811_v32, %v1772_v41 }
 0x189   : > { %1818 = vst.msk [vmem:[%s163_s30] sm:$0xff] %vm1817_vm3, %v1812_v42 }
 0x18a   : > { %2493 = shalt.err (!%p2490_p3)
}
 0x18b   : > { %s2494_s5 = scalar_lea.hbm %s3075_s8, 128  ;;  %s2498_s24 = scalar_lea.hbm %s3120_s3, 1280 }
 0x18c   : > { %p2495_p4 = scmp.ne.s32.totalorder %s3075_s8, %s2494_s5  ;;  %p2499_p9 = scmp.lt.u32.totalorder %s3075_s8, %s3120_s3 }
 0x18d   : > { %p2500_p10 = scmp.lt.u32.totalorder %s2498_s24, %s2494_s5  ;;  %p2502_p12 = scmp.lt.u32.totalorder %s2494_s5, %s3075_s8 }
 0x18e   : > { %p2496_p7 = pnand %p2495_p4, %p2605_p5 }
 0x18f   : > { %p2501_p11 = por %p2500_p10, %p2499_p9 }
 0x190   : > { %p2497_p8 = pneg %p2496_p7 }
 0x191   : > { %p2503_p13 = por %p2502_p12, %p2501_p11 }
 0x193   : > { %p2504_p0 = pnand %p2503_p13, %p2497_p8 }
 0x195   : > { %2507 = shalt.err (!%p2504_p0)
}
 0x196   : > { %2275 = dma.vmem_to_hbm [thread:$0]  (%p2605_p5), %s3077_s4, 128, %s3075_s8, %s1820_s9  }
 0x197 PF: > { %p2281_p1 = scmp.ge.s32.totalorder %s2542_s15, 2  ;;  %s1845_s27 = sand.u32 1, %s2530_s12  }
 0x198   : > { %s1846_s28 = scalar_lea.sflag [#allocation3], %s1845_s27 }
 0x199   : > { %p2278_p2 = pnand %p2281_p1, %p2609_p6 }
 0x19b   : > { %2525 = dma.done.wait (!%p2278_p2), %s1846_s28, 128  }
 0x19c   : > { %2527 = vsyncadd (!%p2278_p2), %s1846_s28, 4294967168  ;;  %p13_p3 = scmp.ge.s32.totalorder %s2592_s18, 12   ;;  %s3123_s12 = smov %s2534_s13 }
 0x19d   : > { %s3124_s13 = smov %s2538_s14  ;;  %s3125_s14 = smov %s2603_s21 }
 0x19e   : > { %s3126_s15 = smov %s2592_s18  ;;  %15 = sbr.rel (!%p13_p3) target bundleno = 3 (0x3), region = 67 }
 0x1a5   :  { %1851 = vsyncpa [#allocation3], 1 }
 0x1a6   :  { %1853 = vsyncpa [#allocation3 + $0x1], 1 }

</bundles_post_ra>
